<compile_context>
chip_gen: v5e
topology: v5e:2x2
jax: 0.10.0
libtpu: 0.0.40
codegen_flags: <defaults>
</compile_context>

<pallas_src>
import jax
import jax.numpy as jnp
from jax.experimental import pallas as pl
from jax.experimental.pallas import tpu as pltpu

KERNEL_SIZE = 4
STRIDE = 2
BN_EPS = 1e-5
NEG_SLOPE = 0.01              # nn.LeakyReLU default

LANE = 128                    # pad K and C_out to the lane width
MAX_TILE_M = 1024             # rows of im2col patches per grid step
VMEM_BUDGET = 40 * 1024 * 1024    # double-buffered working-set budget (v7x-safe)
VMEM_LIMIT = 48 * 1024 * 1024     # scoped VMEM limit handed to Mosaic


def _round_up(x, m):
    return (x + m - 1) // m * m


# -------- Pass 1: tiled matmul -> bf16 y tile + per-tile partial BN statistics --------
def matmul_stats_kernel(p_ref, w_ref, y_ref, stat_ref):
    # p_ref: (TM, Kp) bf16   w_ref: (Kp, Cp) bf16
    # y_ref: (TM, Cp) bf16   stat_ref: (8, Cp) f32 (row 0 = partial sum, row 1 = sum-sq)
    y = jnp.dot(p_ref[...], w_ref[...], preferred_element_type=jnp.float32)
    y_ref[...] = y.astype(y_ref.dtype)
    stat_ref[...] = jnp.zeros_like(stat_ref)
    stat_ref[0:1, :] = jnp.sum(y, axis=0, keepdims=True)
    stat_ref[1:2, :] = jnp.sum(y * y, axis=0, keepdims=True)


# -------- Pass 2: elementwise BN affine + LeakyReLU over the bf16 y intermediate ------
def bn_lrelu_kernel(y_ref, scale_ref, shift_ref, o_ref):
    y = y_ref[...].astype(jnp.float32) * scale_ref[...] + shift_ref[...]
    o_ref[...] = jnp.where(y > 0, y, NEG_SLOPE * y).astype(o_ref.dtype)


def _im2col(x, kh, kw, stride):
    # x: (N, C, H, W) -> patches: (N*OH*OW, C*kh*kw), K ordered (ci, kh, kw)
    n, c, h, w = x.shape
    oh = (h - kh) // stride + 1
    ow = (w - kw) // stride + 1
    cols = []
    for i in range(kh):
        for j in range(kw):
            cols.append(x[:, :, i:i + stride * oh:stride, j:j + stride * ow:stride])
    stacked = jnp.stack(cols, axis=0)                  # (KH*KW, N, C, OH, OW)
    stacked = jnp.transpose(stacked, (1, 3, 4, 2, 0))  # (N, OH, OW, C, KH*KW)
    return stacked.reshape(n * oh * ow, c * kh * kw), (n, oh, ow)


def _choose_tile_m(m, kp, cp):
    tile = min(MAX_TILE_M, _round_up(m, 16))

    def wset(tm):   # double-buffered pass-1 working set (bytes)
        return 2 * tm * kp * 2 + 2 * kp * cp * 2 + 2 * tm * cp * 2 + 2 * 8 * cp * 4

    while tile > 16 and wset(tile) > VMEM_BUDGET:
        tile -= 16
    # v7x megacore: make sure the 'parallel' M axis has >= 2 tiles when there is work.
    if m > 16 and _round_up(m, tile) // tile < 2:
        tile = max(16, _round_up(_round_up(m, 16) // 2, 16))
    return tile


def conv_block_forward(x, conv_w, conv_b, bn_gamma, bn_beta):
    """x: (N, C_in, H, W) NCHW.  Returns (N, C_out, OH, OW) NCHW, float32."""
    del conv_b  # exact no-op: training-mode BN subtracts the per-channel batch mean,
                # which absorbs any per-channel bias added before BN.
    c_out, c_in, kh, kw = conv_w.shape

    # TODO(synk): move im2col inside the kernel (NHWC input slab per (batch, OH-row-tile)
    # grid step, conv as 16 shifted (tile, C_in) @ (C_in, C_out) matmuls) to remove the
    # ~4x patch-materialization HBM traffic entirely.
    patches, (n, oh, ow) = _im2col(x.astype(jnp.bfloat16), kh, kw, STRIDE)
    m, k = patches.shape

    kp = _round_up(k, LANE)
    cp = _round_up(c_out, LANE)
    tile_m = _choose_tile_m(m, kp, cp)
    mp = _round_up(m, tile_m)
    ntiles = mp // tile_m

    # Zero-padded rows/cols contribute exactly zero to the matmul and to the BN
    # sum / sum-of-squares (no conv bias), so statistics over the real M stay exact.
    patches_p = jnp.pad(patches, ((0, mp - m), (0, kp - k)))
    w_mat = conv_w.reshape(c_out, c_in * kh * kw).T.astype(jnp.float32)   # (K, C_out)
    w_p = jnp.pad(w_mat, ((0, kp - k), (0, cp - c_out))).astype(jnp.bfloat16)

    # Pad gamma/beta with zeros -> padded output lanes stay exactly zero through BN.
    gamma_p = jnp.pad(bn_gamma.astype(jnp.float32), (0, cp - c_out))
    beta_p = jnp.pad(bn_beta.astype(jnp.float32), (0, cp - c_out))

    cparams = pltpu.CompilerParams(
        dimension_semantics=("parallel",),
        vmem_limit_bytes=VMEM_LIMIT,
    )

    # ---- Pass 1: tiled matmul -> bf16 y + per-tile partial BN statistics ----
    y_p, stats = pl.pallas_call(
        matmul_stats_kernel,
        out_shape=(
            jax.ShapeDtypeStruct((mp, cp), jnp.bfloat16),
            jax.ShapeDtypeStruct((ntiles * 8, cp), jnp.float32),
        ),
        grid=(ntiles,),
        in_specs=[
            pl.BlockSpec((tile_m, kp), lambda i: (i, 0)),
            pl.BlockSpec((kp, cp), lambda i: (0, 0)),
        ],
        out_specs=(
            pl.BlockSpec((tile_m, cp), lambda i: (i, 0)),
            pl.BlockSpec((8, cp), lambda i: (i, 0)),
        ),
        compiler_params=cparams,
    )(patches_p, w_p)

    # Combine per-tile partials (tiny) and fold BN into a per-channel affine.
    part = stats.reshape(ntiles, 8, cp)
    sum_y = jnp.sum(part[:, 0, :], axis=0)
    sum_sq = jnp.sum(part[:, 1, :], axis=0)
    mean = sum_y / m
    var = jnp.maximum(sum_sq / m - mean * mean, 0.0)   # biased (training-mode) variance
    inv_std = jax.lax.rsqrt(var + BN_EPS)
    scale = (gamma_p * inv_std).reshape(1, cp)
    shift = (beta_p - mean * gamma_p * inv_std).reshape(1, cp)

    # ---- Pass 2: elementwise BN affine + LeakyReLU over the bf16 y intermediate ----
    out_p = pl.pallas_call(
        bn_lrelu_kernel,
        out_shape=jax.ShapeDtypeStruct((mp, cp), jnp.bfloat16),
        grid=(ntiles,),
        in_specs=[
            pl.BlockSpec((tile_m, cp), lambda i: (i, 0)),
            pl.BlockSpec((1, cp), lambda i: (0, 0)),
            pl.BlockSpec((1, cp), lambda i: (0, 0)),
        ],
        out_specs=pl.BlockSpec((tile_m, cp), lambda i: (i, 0)),
        compiler_params=cparams,
    )(y_p, scale, shift)

    # TODO(synk): a downstream ConvBlock could consume the bf16 (M, Cp) / NHWC slab
    # directly; the f32 NCHW restore below exists only to match the module signature.
    out = out_p[:m, :c_out].astype(jnp.float32).reshape(n, oh, ow, c_out)
    return jnp.transpose(out, (0, 3, 1, 2))


def _reference(x, conv_w, conv_b, bn_gamma, bn_beta):
    # Plain-JAX f32 reference of the PyTorch forward (training-mode BN).
    y = jax.lax.conv_general_dilated(
        x, conv_w, window_strides=(STRIDE, STRIDE), padding="VALID",
        dimension_numbers=("NCHW", "OIHW", "NCHW"))
    y = y + conv_b.reshape(1, -1, 1, 1)
    mean = jnp.mean(y, axis=(0, 2, 3), keepdims=True)
    var = jnp.mean((y - mean) ** 2, axis=(0, 2, 3), keepdims=True)
    y = (y - mean) * jax.lax.rsqrt(var + BN_EPS)
    y = y * bn_gamma.reshape(1, -1, 1, 1) + bn_beta.reshape(1, -1, 1, 1)
    return jnp.where(y > 0, y, NEG_SLOPE * y)


if __name__ == "__main__":
    key = jax.random.PRNGKey(0)
    k_x, k_w, k_b, k_g, k_be = jax.random.split(key, 5)

    N, C_IN, H, W = 2, 4, 16, 16
    C_OUT = 8

    x = jax.random.normal(k_x, (N, C_IN, H, W), dtype=jnp.float32)

    fan_in = C_IN * KERNEL_SIZE * KERNEL_SIZE
    bound = 1.0 / float(jnp.sqrt(fan_in))
    conv_w = jax.random.uniform(k_w, (C_OUT, C_IN, KERNEL_SIZE, KERNEL_SIZE),
                                minval=-bound, maxval=bound, dtype=jnp.float32)
    conv_b = jax.random.uniform(k_b, (C_OUT,), minval=-bound, maxval=bound,
                                dtype=jnp.float32)
    bn_gamma = 1.0 + 0.1 * jax.random.normal(k_g, (C_OUT,), dtype=jnp.float32)
    bn_beta = 0.1 * jax.random.normal(k_be, (C_OUT,), dtype=jnp.float32)

    y = conv_block_forward(x, conv_w, conv_b, bn_gamma, bn_beta)
    jax.block_until_ready(y)

    oh = (H - KERNEL_SIZE) // STRIDE + 1
    ow = (W - KERNEL_SIZE) // STRIDE + 1
    assert y.shape == (N, C_OUT, oh, ow)

    y_ref = _reference(x, conv_w, conv_b, bn_gamma, bn_beta)
    max_err = float(jnp.max(jnp.abs(y - y_ref)))
    assert max_err < 1e-1, f"max abs error {max_err} too large"

    print("KERNEL_OK")
</pallas_src>

<mosaic_0001>
module attributes {stable_mosaic.version = 11 : i64} {
  func.func @matmul_stats_kernel(%arg0: i32, %arg1: memref<64x128xbf16, #tpu.memory_space<vmem>>, %arg2: memref<128x128xbf16, #tpu.memory_space<vmem>>, %arg3: memref<64x128xbf16, #tpu.memory_space<vmem>>, %arg4: memref<8x128xf32, #tpu.memory_space<vmem>>) attributes {dimension_semantics = [#tpu.dimension_semantics<parallel>], iteration_bounds = array<i64: 2>, scalar_prefetch = 0 : i64, scratch_operands = 0 : i64, tpu.core_type = #tpu.core_type<tc>, window_params = [{transform_indices = @transform_0, window_bounds = array<i64: 64, 128>}, {pipeline_mode = #tpu.pipeline_mode<synchronous>, transform_indices = @transform_1, window_bounds = array<i64: 128, 128>}, {transform_indices = @transform_2, window_bounds = array<i64: 64, 128>}, {transform_indices = @transform_3, window_bounds = array<i64: 8, 128>}]} {
    %c0 = arith.constant 0 : index
    %c0_0 = arith.constant 0 : index
    %0 = vector.load %arg1[%c0, %c0_0] : memref<64x128xbf16, #tpu.memory_space<vmem>>, vector<64x128xbf16>
    %c0_1 = arith.constant 0 : index
    %c0_2 = arith.constant 0 : index
    %1 = vector.load %arg2[%c0_1, %c0_2] : memref<128x128xbf16, #tpu.memory_space<vmem>>, vector<128x128xbf16>
    %cst = arith.constant dense<0.000000e+00> : vector<64x128xf32>
    %2 = tpu.matmul %0, %1, %cst {dimension_numbers = #tpu.dot_dimension_numbers<[1], [0], [0], [1], [0, 0, 1, 1], [], []>} : vector<64x128xbf16>, vector<128x128xbf16>, vector<64x128xf32> -> vector<64x128xf32>
    %3 = arith.truncf %2 : vector<64x128xf32> to vector<64x128xbf16>
    %c0_3 = arith.constant 0 : index
    %c0_4 = arith.constant 0 : index
    %4 = vector.load %arg3[%c0_3, %c0_4] : memref<64x128xbf16, #tpu.memory_space<vmem>>, vector<64x128xbf16>
    tpu.vector_store %arg3[%c0_3, %c0_4], %3 {strides = array<i32>} : memref<64x128xbf16, #tpu.memory_space<vmem>>, vector<64x128xbf16>,
    %cst_5 = arith.constant 0.000000e+00 : f32
    %5 = vector.broadcast %cst_5 : f32 to vector<8x128xf32>
    %c0_6 = arith.constant 0 : index
    %c0_7 = arith.constant 0 : index
    %6 = vector.load %arg4[%c0_6, %c0_7] : memref<8x128xf32, #tpu.memory_space<vmem>>, vector<8x128xf32>
    tpu.vector_store %arg4[%c0_6, %c0_7], %5 {strides = array<i32>} : memref<8x128xf32, #tpu.memory_space<vmem>>, vector<8x128xf32>,
    %cst_8 = arith.constant dense<0.000000e+00> : vector<128xf32>
    %7 = vector.multi_reduction <add>, %2, %cst_8 [0] : vector<64x128xf32> to vector<128xf32>
    %8 = vector.shape_cast %7 : vector<128xf32> to vector<1x128xf32>
    %c0_9 = arith.constant 0 : index
    %c0_10 = arith.constant 0 : index
    %9 = vector.load %arg4[%c0_9, %c0_10] : memref<8x128xf32, #tpu.memory_space<vmem>>, vector<1x128xf32>
    tpu.vector_store %arg4[%c0_9, %c0_10], %8 {strides = array<i32>} : memref<8x128xf32, #tpu.memory_space<vmem>>, vector<1x128xf32>,
    %10 = arith.mulf %2, %2 : vector<64x128xf32>
    %cst_11 = arith.constant dense<0.000000e+00> : vector<128xf32>
    %11 = vector.multi_reduction <add>, %10, %cst_11 [0] : vector<64x128xf32> to vector<128xf32>
    %12 = vector.shape_cast %11 : vector<128xf32> to vector<1x128xf32>
    %c1 = arith.constant 1 : index
    %c0_12 = arith.constant 0 : index
    %13 = vector.load %arg4[%c1, %c0_12] : memref<8x128xf32, #tpu.memory_space<vmem>>, vector<1x128xf32>
    tpu.vector_store %arg4[%c1, %c0_12], %12 {strides = array<i32>} : memref<8x128xf32, #tpu.memory_space<vmem>>, vector<1x128xf32>,
    return
  }
  func.func @transform_0(%arg0: i32) -> (i32, i32) {
    %c0_i32 = arith.constant 0 : i32
    %c0_i32_0 = arith.constant 0 : i32
    return %arg0, %c0_i32 : i32, i32
  }
  func.func @transform_1(%arg0: i32) -> (i32, i32) {
    %c0_i32 = arith.constant 0 : i32
    %c0_i32_0 = arith.constant 0 : i32
    %c0_i32_1 = arith.constant 0 : i32
    return %c0_i32, %c0_i32_0 : i32, i32
  }
  func.func @transform_2(%arg0: i32) -> (i32, i32) {
    %c0_i32 = arith.constant 0 : i32
    %c0_i32_0 = arith.constant 0 : i32
    return %arg0, %c0_i32 : i32, i32
  }
  func.func @transform_3(%arg0: i32) -> (i32, i32) {
    %c0_i32 = arith.constant 0 : i32
    %c0_i32_0 = arith.constant 0 : i32
    return %arg0, %c0_i32 : i32, i32
  }
}

</mosaic_0001>

<bundles_post_ra>
// kernel: tpu_custom_call.1
= control target key start
LH: loop header
LB: loop body
LE: loop exit
PB: predicated region body
PF: predicated region fallthrough
CT: control target
= control target key end

     0   :  { %9 = vsyncpa [#allocation3], 0  ;;  %s1114_s0 = inlined_call_operand.hbm [shape: bf16[128,128], index: 0, kind: input, shape index: {}]   ;;  %s1115_s1 = inlined_call_operand.hbm [shape: bf16[128,128], index: 1, kind: input, shape index: {}]   ;;  %s1116_s2 = inlined_call_operand.hbm [shape: bf16[128,128], index: 2, kind: output, shape index: {0}]   ;;  %s1117_s3 = inlined_call_operand.hbm [shape: f32[16,128], index: 3, kind: output, shape index: {1}]  }
   0x1   :  { %11 = vsyncpa [#allocation3 + $0x1], 0 }
   0x2   :  { %12 = vsyncpa [#allocation6], 0 }
   0x3   :  { %13 = vsyncpa [#allocation4], 0 }
   0x4   :  { %15 = vsyncpa [#allocation4 + $0x1], 0 }
   0x5   :  { %16 = vsyncpa [#allocation9], 0 }
   0x6   :  { %18 = vsyncpa [#allocation9 + $0x1], 0  ;;  %s935_s12 = smov 0   ;;  %s937_s13 = smov 0  }
   0x7   :  { %s939_s14 = smov 0   ;;  %s941_s15 = smov 0  }
   0x8 LB: > { %s956_s16 = sadd.s32 4294967295, %s907_s15   ;;  %s550_s17 = sadd.s32 4294967294, %s907_s15   ;;  %s907_s15 = sphi %s941_s15, %s1127_s15   ;;  %s903_s14 = sphi %s939_s14, %s1126_s14   ;;  %s899_s13 = sphi %s937_s13, %s1125_s13   ;;  %s895_s12 = sphi %s935_s12, %s1124_s12  }
   0x9   : > { %p44_p0 = scmp.ne.s32.totalorder %s899_s13, %s895_s12  ;;  %p45_p1 = scmp.eq.s32.totalorder %s956_s16, 0 }
   0xa   : > { %p89_p2 = scmp.eq.s32.totalorder %s956_s16, 1  ;;  %p95_p3 = scmp.eq.s32.totalorder %s550_s17, 1 }
   0xb   : > { %p965_p4 = por %p45_p1, %p44_p0  ;;  %p551_p5 = scmp.ge.s32.totalorder %s907_s15, 1 }
   0xc   : > { %p970_p6 = por %p95_p3, %p44_p0  ;;  %p128_p7 = scmp.lt.s32.totalorder %s907_s15, 3 }
   0xd   : > { %s139_s22 = sshll.u32 %s1115_s1, 4  ;;  %s909_s24 = smov [#allocation5]   ;;  %s140_s22 = int_to_ptr.hbm [resolvable:$true] %s139_s22 }
   0xe   : > { %p978_p8 = pnand %p551_p5, %p128_p7  ;;  %s141_s25 = sshll.u32 %s909_s24, 4  ;;  %s142_s25 = int_to_ptr.vmem [resolvable:$true] %s141_s25 }
   0xf   : > { %s988_s26 = sadd.s32 1, %s907_s15   ;;  %s910_s27 = smov 64  }
  0x10   : > { %p688_p9 = pneg %p978_p8  ;;  %s911_s28 = smov 4  }
  0x11   : > { %s28_s29 = ssub.s32 %s907_s15, %s988_s26  ;;  %s31_s30 = sadd.s32 1, %s903_s14 }
  0x12   : > { %p689_p10 = pnand %p688_p9, %p45_p1  ;;  %p29_p12 = scmp.eq.s32.totalorder %s28_s29, 0 }
  0x13   : > { %p38_p13 = scmp.ne.s32.totalorder %s903_s14, %s899_s13  ;;  %p39_p0 = scmp.eq.s32.totalorder %s907_s15, 0 }
  0x14   : > { %691 = dma.hbm_to_vmem [thread:$0]  (!%p689_p10), %s140_s22, 1024, %s142_s25, [#allocation6], %s910_s27, %s910_s27, %s911_s28  }
  0x15   : > { %s1000_s4 = scalar_select %p29_p12, %s903_s14, %s31_s30  }
  0x16   : > { %p1004_p3 = por %p89_p2, %p38_p13  ;;  %p704_p5 = scmp.lt.s32.totalorder %s907_s15, 2 }
  0x17   : > { %s155_s6 = sand.u32 1, %s903_s14   ;;  %s617_s7 = sshll.u32 %s907_s15, 5 }
  0x18   : > { %p40_p7 = por %p39_p0, %p38_p13  ;;  %s554_s8 = sshll.u32 %s155_s6, 5 }
  0x19   : > { %s164_s11 = scalar_lea.hbm %s1114_s0, %s617_s7  ;;  %s159_s20 = scalar_lea.vmem [#allocation2], %s554_s8 }
  0x1a   : > { %s165_s17 = sshll.u32 %s164_s11, 4  ;;  %s167_s21 = sshll.u32 %s159_s20, 4  ;;  %s166_s17 = int_to_ptr.hbm [resolvable:$true] %s165_s17  ;;  %s168_s21 = int_to_ptr.vmem [resolvable:$true] %s167_s21 }
  0x1b   : > { %p1014_p9 = pnand %p704_p5, %p40_p7  ;;  %s156_s24 = scalar_lea.sflag [#allocation3], %s155_s6 }
  0x1c   : > { %s775_s25 = sshra.s32 %s166_s17, 4  ;;  %s782_s8 = scalar_lea.hbm %s1114_s0, 64  ;;  %s776_s25 = int_to_ptr.hbm [resolvable:$true] %s775_s25 }
  0x1d   : > { %s777_s29 = scalar_lea.hbm %s776_s25, 32  ;;  %p779_p10 = pneg %p1014_p9 }
  0x1e   : > { %p778_p2 = scmp.ne.s32.totalorder %s776_s25, %s777_s29  ;;  %p783_p0 = scmp.lt.s32.totalorder %s776_s25, %s1114_s0 }
  0x1f   : > { %p784_p5 = scmp.lt.s32.totalorder %s782_s8, %s777_s29 }
  0x20   : > { %p780_p12 = pnand %p779_p10, %p778_p2 }
  0x21   : > { %p785_p7 = por %p784_p5, %p783_p0 }
  0x22   : > { %p781_p13 = pneg %p780_p12 }
  0x24   : > { %p786_p11 = pnand %p785_p7, %p781_p13 }
  0x26   : > { %789 = shalt.err (!%p786_p11)
}
  0x27   : > { %695 = dma.hbm_to_vmem [thread:$0]  (!%p1014_p9), %s166_s17, 512, %s168_s21, %s156_s24, %s910_s27, %s910_s27, %s911_s28  }
  0x28   : > { %179 = sbr.rel (%p978_p8) target bundleno = 245 (0xf5), region = 28  ;;  %s1034_s6 = sand.u32 (!%p978_p8), 1, %s899_s13  }
  0x29   : > { %s558_s11 = sshll.u32 (!%p978_p8), %s1034_s6, 5  ;;  %s182_s20 = scalar_lea.sflag (!%p978_p8), [#allocation3], %s1034_s6 }
  0x2a   : > { %s1040_s25 = scalar_lea.vmem (!%p978_p8), [#allocation2], %s558_s11 }
  0x2d   : > { %878 = dma.done.wait (%p965_p4), %s182_s20, 512  }
  0x2e   : > { %880 = vsyncadd (%p965_p4), %s182_s20, 4294966784 }
  0x2f   : > { %882 = dma.done.wait (%p45_p1), [#allocation6], 1024  }
  0x30   : > { %884 = vsyncadd (%p45_p1), [#allocation6], 4294966272  ;;  %v629_v0 = vld [vmem:[#allocation5 + $0x38] sm:$0xff]  ;;  %v628_v1 = vld [vmem:[#allocation5 + $0x30] sm:$0xff]  ;;  %s561_s18 = sshll.u32 %s1034_s6, 3  ;;  %v912_v14 = vmov 0.0  }
  0x31   : > { %317 = vmatpush.bf16.msra.mxu0 %v629_v0  ;;  %654 = vmatpush.bf16.msra.mxu1 %v629_v0  ;;  %v627_v2 = vld [vmem:[#allocation5 + $0x28] sm:$0xff]  ;;  %v626_v3 = vld [vmem:[#allocation5 + $0x20] sm:$0xff]  ;;  %v625_v4 = vld [vmem:[#allocation5 + $0x18] sm:$0xff]  ;;  %s1055_s23 = scalar_lea.vmem [#allocation8], %s561_s18  ;;  %s630_s27 = sshll.u32 %s956_s16, 5 }
  0x32   : > { %655 = vmatpush.bf16.msra.mxu2 %v629_v0  ;;  %656 = vmatpush.bf16.msra.mxu3 %v629_v0  ;;  %v624_v5 = vld [vmem:[#allocation5 + $0x10] sm:$0xff]  ;;  %v623_v6 = vld [vmem:[#allocation5 + $0x8] sm:$0xff]  ;;  %v622_v7 = vld [vmem:[#allocation5] sm:$0xff]  ;;  %362 = vst [vmem:[%s1055_s23] sm:$0xff] %v912_v14  ;;  %s211_s28 = scalar_lea.vmem [#allocation7], %s558_s11  ;;  %s416_s22 = scalar_lea.hbm %s1116_s2, %s630_s27 }
  0x33   : > { %v618_v8 = vld [vmem:[%s1040_s25] sm:$0xff]  ;;  %v619_v9 = vld [vmem:[%s1040_s25 + $0x8] sm:$0xff]  ;;  %v620_v10 = vld [vmem:[%s1040_s25 + $0x10] sm:$0xff]  ;;  %s417_s24 = sshll.u32 %s211_s28, 4  ;;  %s419_s29 = sshll.u32 %s416_s22, 4  ;;  %s1064_s24 = int_to_ptr.vmem [resolvable:$true] %s417_s24  ;;  %s420_s29 = int_to_ptr.hbm [resolvable:$true] %s419_s29 }
  0x34   : > { %v621_v11 = vld [vmem:[%s1040_s25 + $0x18] sm:$0xff]  ;;  %s400_s30 = scalar_lea.sflag [#allocation4], %s1034_s6  ;;  %s819_s7 = sshra.s32 %s420_s29, 4  ;;  %s820_s7 = int_to_ptr.hbm [resolvable:$true] %s819_s7 }
  0x35   : > { %318 = vmatpush.bf16.msra.mxu0 %v628_v1  ;;  %657 = vmatpush.bf16.msra.mxu1 %v628_v1  ;;  %s821_s8 = scalar_lea.hbm %s820_s7, 32  ;;  %s825_s11 = scalar_lea.hbm %s1116_s2, 64 }
  0x36   : > { %658 = vmatpush.bf16.msra.mxu2 %v628_v1  ;;  %659 = vmatpush.bf16.msra.mxu3 %v628_v1  ;;  %p822_p1 = scmp.ne.s32.totalorder %s820_s7, %s821_s8  ;;  %p826_p11 = scmp.lt.s32.totalorder %s820_s7, %s1116_s2 }
  0x37   : > { %p827_p9 = scmp.lt.s32.totalorder %s825_s11, %s821_s8 }
  0x38   : > { %p823_p4 = pnand %p822_p1, %p1004_p3 }
  0x39   : > { %319 = vmatpush.bf16.msra.mxu0 %v627_v2  ;;  %660 = vmatpush.bf16.msra.mxu1 %v627_v2  ;;  %p828_p2 = por %p827_p9, %p826_p11 }
  0x3a   : > { %661 = vmatpush.bf16.msra.mxu2 %v627_v2  ;;  %662 = vmatpush.bf16.msra.mxu3 %v627_v2  ;;  %p824_p8 = pneg %p823_p4 }
  0x3c   : > { %p829_p10 = pnand %p828_p2, %p824_p8 }
  0x3d   : > { %320 = vmatpush.bf16.msra.mxu0 %v626_v3  ;;  %663 = vmatpush.bf16.msra.mxu1 %v626_v3 }
  0x3e   : > { %664 = vmatpush.bf16.msra.mxu2 %v626_v3  ;;  %665 = vmatpush.bf16.msra.mxu3 %v626_v3 }
  0x41   : > { %321 = vmatpush.bf16.msra.mxu0 %v625_v4  ;;  %666 = vmatpush.bf16.msra.mxu1 %v625_v4 }
  0x42   : > { %667 = vmatpush.bf16.msra.mxu2 %v625_v4  ;;  %668 = vmatpush.bf16.msra.mxu3 %v625_v4 }
  0x45   : > { %322 = vmatpush.bf16.msra.mxu0 %v624_v5  ;;  %669 = vmatpush.bf16.msra.mxu1 %v624_v5 }
  0x46   : > { %670 = vmatpush.bf16.msra.mxu2 %v624_v5  ;;  %671 = vmatpush.bf16.msra.mxu3 %v624_v5 }
  0x49   : > { %323 = vmatpush.bf16.msra.mxu0 %v623_v6  ;;  %672 = vmatpush.bf16.msra.mxu1 %v623_v6 }
  0x4a   : > { %673 = vmatpush.bf16.msra.mxu2 %v623_v6  ;;  %674 = vmatpush.bf16.msra.mxu3 %v623_v6 }
  0x4d   : > { %324 = vmatpush.bf16.msra.mxu0 %v622_v7  ;;  %675 = vmatpush.bf16.msra.mxu1 %v622_v7 }
  0x4e   : > { %676 = vmatpush.bf16.msra.mxu2 %v622_v7  ;;  %677 = vmatpush.bf16.msra.mxu3 %v622_v7 }
  0x50   : > { %325 = vmatmul.bf16.vlgmr.msra.gmra.mxu0 %v618_v8  ;;  %330 = vmatmul.bf16.vlgmr.msra.gmra.mxu1 %v619_v9 }
  0x51   : > { %335 = vmatmul.bf16.vlgmr.msra.gmra.mxu2 %v620_v10  ;;  %340 = vmatmul.bf16.vlgmr.msra.gmra.mxu3 %v621_v11 }
  0xcd   : > { %v326_v12 = vpop.f32.mrf.mxu0  ;;  %v331_v13 = vpop.f32.mrf.mxu1 }
  0xce   : > { %v377_v17 = vmul.f32 %v326_v12, %v326_v12  ;;  %v379_v24 = vmul.f32 %v331_v13, %v331_v13 }
  0xd4   : > { %v336_v15 = vpop.f32.mrf.mxu2  ;;  %v341_v16 = vpop.f32.mrf.mxu3 }
  0xd5   : > { %v328_v18 = vpop.f32.mrf.mxu0  ;;  %v333_v19 = vpop.f32.mrf.mxu1  ;;  %v381_v30 = vmul.f32 %v336_v15, %v336_v15  ;;  %v383_v40 = vmul.f32 %v341_v16, %v341_v16 }
  0xd6   : > { %v634_v20 = vpack.c.bf16 %v328_v18, %v326_v12  ;;  %v363_v21 = vadd.f32 %v328_v18, %v326_v12  ;;  %v378_v22 = vmul.f32 %v328_v18, %v328_v18  ;;  %v639_v23 = vpack.c.bf16 %v333_v19, %v331_v13 }
  0xd7   : > { %v380_v28 = vmul.f32 %v333_v19, %v333_v19 }
  0xd8   : > { %635 = vst [vmem:[%s211_s28] sm:$0xff] %v634_v20   ;;  %v385_v25 = vadd.f32 %v378_v22, %v377_v17  ;;  %v364_v26 = vadd.f32 %v363_v21, %v331_v13 }
  0xd9   : > { %651 = vst [vmem:[%s211_s28 + $0x8] sm:$0xff] %v639_v23  }
  0xda   : > { %v365_v27 = vadd.f32 %v364_v26, %v333_v19  ;;  %v386_v29 = vadd.f32 %v385_v25, %v379_v24 }
  0xdc   : > { %v387_v31 = vadd.f32 %v386_v29, %v380_v28  ;;  %v338_v32 = vpop.f32.mrf.mxu2  ;;  %v366_v33 = vadd.f32 %v365_v27, %v336_v15  ;;  %v343_v34 = vpop.f32.mrf.mxu3 }
  0xdd   : > { %v644_v35 = vpack.c.bf16 %v338_v32, %v336_v15  ;;  %v649_v36 = vpack.c.bf16 %v343_v34, %v341_v16  ;;  %v382_v38 = vmul.f32 %v338_v32, %v338_v32 }
  0xde   : > { %v367_v37 = vadd.f32 %v366_v33, %v338_v32  ;;  %v388_v39 = vadd.f32 %v387_v31, %v381_v30 }
  0xdf   : > { %652 = vst [vmem:[%s211_s28 + $0x10] sm:$0xff] %v644_v35  }
  0xe0   : > { %v389_v41 = vadd.f32 %v388_v39, %v382_v38  ;;  %653 = vst [vmem:[%s211_s28 + $0x18] sm:$0xff] %v649_v36   ;;  %v368_v42 = vadd.f32 %v367_v37, %v341_v16 }
  0xe1   : > { %832 = shalt.err (!%p829_p10)
}
  0xe2   : > { %s913_s18 = smov 64   ;;  %s914_s27 = smov 4   ;;  %v369_v43 = vadd.f32 %v368_v42, %v343_v34  ;;  %v384_v44 = vmul.f32 %v343_v34, %v343_v34  ;;  %v390_v45 = vadd.f32 %v389_v41, %v383_v40 }
  0xe3   : > { %684 = dma.vmem_to_hbm [thread:$0]  (%p1004_p3), %s1064_s24, 512, %s420_s29, %s400_s30, %s913_s18, %s913_s18, %s914_s27  }
  0xe4   : > { %v370_v46 = vrot.slane %v369_v43, 4  ;;  %v391_v47 = vadd.f32 %v390_v45, %v384_v44  ;;  %s614_s28 = sshll.u32 %s956_s16, 3  ;;  %s434_s24 = sshll.u32 %s1055_s23, 4  ;;  %s435_s24 = int_to_ptr.vmem [resolvable:$true] %s434_s24 }
  0xe5   : > { %s432_s22 = scalar_lea.hbm %s1117_s3, %s614_s28  ;;  %s405_s16 = scalar_lea.sflag [#allocation9], %s1034_s6 }
  0xe6   : > { %v371_v48 = vadd.f32 %v370_v46, %v369_v43  ;;  %v392_v49 = vrot.slane %v391_v47, 4  ;;  %s436_s29 = sshll.u32 %s432_s22, 4  ;;  %s853_s10 = scalar_lea.hbm %s1117_s3, 16  ;;  %s437_s29 = int_to_ptr.hbm [resolvable:$true] %s436_s29 }
  0xe7   : > { %s847_s30 = sshra.s32 %s437_s29, 4  ;;  %s848_s30 = int_to_ptr.hbm [resolvable:$true] %s847_s30 }
  0xe8   : > { %v372_v50 = vrot.slane %v371_v48, 2  ;;  %v393_v51 = vadd.f32 %v392_v49, %v391_v47  ;;  %s849_s7 = scalar_lea.hbm %s848_s30, 8  ;;  %p854_p5 = scmp.lt.s32.totalorder %s848_s30, %s1117_s3 }
  0xe9   : > { %p850_p12 = scmp.ne.s32.totalorder %s848_s30, %s849_s7  ;;  %p855_p7 = scmp.lt.s32.totalorder %s853_s10, %s849_s7 }
  0xea   : > { %v373_v52 = vadd.f32 %v372_v50, %v371_v48  ;;  %v394_v53 = vrot.slane %v393_v51, 2 }
  0xeb   : > { %p851_p13 = pnand %p850_p12, %p1004_p3  ;;  %p856_p1 = por %p855_p7, %p854_p5 }
  0xec   : > { %v374_v54 = vrot.slane %v373_v52, 1  ;;  %v395_v55 = vadd.f32 %v394_v53, %v393_v51 }
  0xed   : > { %p852_p0 = pneg %p851_p13 }
  0xee   : > { %v375_v56 = vadd.f32 %v374_v54, %v373_v52  ;;  %v396_v57 = vrot.slane %v395_v55, 1 }
  0xef   : > { %p857_p4 = pnand %p856_p1, %p852_p0 }
  0xf0   : > { %v397_v58 = vadd.f32 %v396_v57, %v395_v55  ;;  %376 = vst [vmem:[%s1055_s23] sm:$0x1] %v375_v56 }
  0xf2   : > { %398 = vst [vmem:[%s1055_s23 + $0x1] sm:$0x1] %v397_v58 }
  0xf3   : > { %860 = shalt.err (!%p857_p4)
}
  0xf4   : > { %685 = dma.vmem_to_hbm [thread:$0]  (%p1004_p3), %s435_s24, 128, %s437_s29, %s405_s16  }
  0xf5 PF: > { %s448_s6 = sand.u32 1, %s895_s12   ;;  %p1123_p8 = scmp.ge.s32.totalorder %s907_s15, 2 }
  0xf6   : > { %s449_s23 = scalar_lea.sflag [#allocation4], %s448_s6 }
  0xf7   : > { %p697_p11 = pnand %p1123_p8, %p970_p6 }
  0xf9   : > { %p698_p9 = pneg %p697_p11 }
  0xfb   : > { %886 = dma.done.wait (%p698_p9), %s449_s23, 512  }
  0xfc   : > { %888 = vsyncadd (%p698_p9), %s449_s23, 4294966784  ;;  %s459_s25 = scalar_lea.sflag [#allocation9], %s448_s6 }
  0xfd   : > { %890 = dma.done.wait (%p698_p9), %s459_s25, 128  }
  0xfe   : > { %892 = vsyncadd (%p698_p9), %s459_s25, 4294967168  ;;  %p21_p3 = scmp.ge.s32.totalorder %s988_s26, 4   ;;  %s1124_s12 = smov %s899_s13 }
  0xff   : > { %s1125_s13 = smov %s903_s14  ;;  %s1126_s14 = smov %s1000_s4 }
 0x100   : > { %s1127_s15 = smov %s988_s26  ;;  %23 = sbr.rel (!%p21_p3) target bundleno = 8 (0x8), region = 94 }
 0x105   :  { %465 = vsyncpa [#allocation3], 1 }
 0x106   :  { %467 = vsyncpa [#allocation3 + $0x1], 1 }
 0x107   :  { %468 = vsyncpa [#allocation6], 1 }
 0x108   :  { %469 = vsyncpa [#allocation4], 1 }
 0x109   :  { %471 = vsyncpa [#allocation4 + $0x1], 1 }
 0x10a   :  { %472 = vsyncpa [#allocation9], 1 }
 0x10b   :  { %474 = vsyncpa [#allocation9 + $0x1], 1 }

</bundles_post_ra>
